<compile_context>
chip_gen: v6e
topology: v6e:2x2x1
jax: 0.10.0
libtpu: 0.0.40
codegen_flags: <defaults>
</compile_context>

<pallas_src>
import numpy as np
import jax
import jax.numpy as jnp
from jax.experimental import pallas as pl
from jax.experimental.pallas import tpu as pltpu


def _make_kernel(num_fields: int):
    def kernel(idx_sref, *refs):
        # idx_sref: (B*F,) int32 in SMEM (scalar prefetch; consumed by the
        #           BlockSpec index_maps, unused in the body).
        # refs    : num_fields gathered rows (1,1,D), bias (1,1,D), out (1,1,D)
        del idx_sref
        row_refs = refs[:num_fields]
        bias_ref = refs[num_fields]
        o_ref = refs[num_fields + 1]
        acc = bias_ref[...].astype(jnp.float32)
        for r in row_refs:                      # F is small & static: unrolled adds
            acc = acc + r[...].astype(jnp.float32)
        o_ref[...] = acc
    return kernel


def features_linear(x, offsets, table, bias):
    """x: (B, F) int; offsets: (F,) int; table: (V, D) float; bias: (D,) float."""
    B, F = x.shape
    V, D = table.shape

    # Flat indices into the single concatenated vocabulary.  Flattened to 1-D
    # so the SMEM scalar-prefetch operand pads to next_pow2(4*B*F) bytes
    # instead of a lane-padded (B, 128) 2-D block.
    idx = (x.astype(jnp.int32) + offsets.reshape(1, F).astype(jnp.int32)).reshape(-1)

    # 3-D views: trailing two dims of every block equal the full array dims,
    # which is legal for any D (no padding of D, no (8,128) divisibility issue).
    table3 = table.astype(jnp.float32).reshape(V, 1, D)
    bias3 = bias.astype(jnp.float32).reshape(1, 1, D)

    def table_spec(f):
        # One (1, 1, D) embedding row per grid step, row chosen by the
        # prefetched flat index of field f for batch row b.
        return pl.BlockSpec(
            (1, 1, D), lambda b, idx_ref, f=f: (idx_ref[b * F + f], 0, 0))

    in_specs = [table_spec(f) for f in range(F)]
    # Bias: constant index_map -> fetched once, resident across the grid.
    in_specs.append(pl.BlockSpec((1, 1, D), lambda b, idx_ref: (0, 0, 0)))

    # True traffic: B*F gathered rows + indices + output + bias.
    cost = pl.CostEstimate(
        flops=B * (F + 1) * D,
        transcendentals=0,
        bytes_accessed=B * F * D * 4 + B * F * 4 + B * D * 4 + D * 4,
    )

    out3 = pl.pallas_call(
        _make_kernel(F),
        out_shape=jax.ShapeDtypeStruct((B, 1, D), jnp.float32),
        grid_spec=pltpu.PrefetchScalarGridSpec(
            num_scalar_prefetch=1,
            grid=(B,),
            in_specs=in_specs,
            out_specs=pl.BlockSpec((1, 1, D), lambda b, idx_ref: (b, 0, 0)),
        ),
        compiler_params=pltpu.CompilerParams(
            dimension_semantics=("parallel",),   # v7x megacore splits the batch
        ),
        cost_estimate=cost,
    )(idx, *([table3] * F), bias3)

    return out3.reshape(B, D)


def _reference(x, offsets, table, bias):
    idx = x + offsets[None, :]
    return jnp.sum(table[idx], axis=1) + bias[None, :]


if __name__ == "__main__":
    # Small synthetic config consistent with the module's __init__.
    field_dims = np.array([3, 5, 4, 6], dtype=np.int64)    # num_fields = 4
    vocab = int(field_dims.sum())                          # 18
    batch = 8
    num_fields = len(field_dims)

    # offsets = (0, cumsum(field_dims)[:-1])
    offsets = jnp.asarray(
        np.array((0, *np.cumsum(field_dims)[:-1]), dtype=np.int32))

    key = jax.random.PRNGKey(0)
    k_w, k_w2, k_x = jax.random.split(key, 3)

    # Per-field categorical indices in [0, field_dims[f]).
    x_cols = []
    for f in range(num_fields):
        k_x, k_f = jax.random.split(k_x)
        x_cols.append(jax.random.randint(
            k_f, (batch,), 0, int(field_dims[f]), dtype=jnp.int32))
    x = jnp.stack(x_cols, axis=1)                          # (batch, F) int32

    # --- D == 1 (default FM case) -----------------------------------------
    table1 = jax.random.normal(k_w, (vocab, 1), dtype=jnp.float32)
    bias1 = jnp.zeros((1,), dtype=jnp.float32)
    out1 = jax.block_until_ready(features_linear(x, offsets, table1, bias1))
    ref1 = _reference(x, offsets, table1, bias1)
    np.testing.assert_allclose(np.asarray(out1), np.asarray(ref1),
                               rtol=1e-6, atol=1e-6)

    # --- D > 1 (output_dim = 4) --------------------------------------------
    table4 = jax.random.normal(k_w2, (vocab, 4), dtype=jnp.float32)
    bias4 = jnp.zeros((4,), dtype=jnp.float32)
    out4 = jax.block_until_ready(features_linear(x, offsets, table4, bias4))
    ref4 = _reference(x, offsets, table4, bias4)
    np.testing.assert_allclose(np.asarray(out4), np.asarray(ref4),
                               rtol=1e-6, atol=1e-6)

    print("KERNEL_OK")
</pallas_src>

<mosaic_0001>
module attributes {stable_mosaic.version = 11 : i64} {
  func.func @kernel(%arg0: i32, %arg1: memref<32xi32, #tpu.memory_space<smem>>, %arg2: memref<1x1x1xf32, #tpu.memory_space<vmem>>, %arg3: memref<1x1x1xf32, #tpu.memory_space<vmem>>, %arg4: memref<1x1x1xf32, #tpu.memory_space<vmem>>, %arg5: memref<1x1x1xf32, #tpu.memory_space<vmem>>, %arg6: memref<1x1x1xf32, #tpu.memory_space<vmem>>, %arg7: memref<1x1x1xf32, #tpu.memory_space<vmem>>) attributes {dimension_semantics = [#tpu.dimension_semantics<parallel>], iteration_bounds = array<i64: 8>, scalar_prefetch = 1 : i64, scratch_operands = 0 : i64, tpu.core_type = #tpu.core_type<tc>, window_params = [{transform_indices = @transform_0, window_bounds = array<i64: 1, 1, 1>}, {transform_indices = @transform_1, window_bounds = array<i64: 1, 1, 1>}, {transform_indices = @transform_2, window_bounds = array<i64: 1, 1, 1>}, {transform_indices = @transform_3, window_bounds = array<i64: 1, 1, 1>}, {pipeline_mode = #tpu.pipeline_mode<synchronous>, transform_indices = @transform_4, window_bounds = array<i64: 1, 1, 1>}, {transform_indices = @transform_5, window_bounds = array<i64: 1, 1, 1>}]} {
    %c0 = arith.constant 0 : index
    %c0_0 = arith.constant 0 : index
    %c0_1 = arith.constant 0 : index
    %0 = vector.load %arg6[%c0, %c0_0, %c0_1] : memref<1x1x1xf32, #tpu.memory_space<vmem>>, vector<1x1x1xf32>
    %c0_2 = arith.constant 0 : index
    %c0_3 = arith.constant 0 : index
    %c0_4 = arith.constant 0 : index
    %1 = vector.load %arg2[%c0_2, %c0_3, %c0_4] : memref<1x1x1xf32, #tpu.memory_space<vmem>>, vector<1x1x1xf32>
    %2 = arith.addf %0, %1 : vector<1x1x1xf32>
    %c0_5 = arith.constant 0 : index
    %c0_6 = arith.constant 0 : index
    %c0_7 = arith.constant 0 : index
    %3 = vector.load %arg3[%c0_5, %c0_6, %c0_7] : memref<1x1x1xf32, #tpu.memory_space<vmem>>, vector<1x1x1xf32>
    %4 = arith.addf %2, %3 : vector<1x1x1xf32>
    %c0_8 = arith.constant 0 : index
    %c0_9 = arith.constant 0 : index
    %c0_10 = arith.constant 0 : index
    %5 = vector.load %arg4[%c0_8, %c0_9, %c0_10] : memref<1x1x1xf32, #tpu.memory_space<vmem>>, vector<1x1x1xf32>
    %6 = arith.addf %4, %5 : vector<1x1x1xf32>
    %c0_11 = arith.constant 0 : index
    %c0_12 = arith.constant 0 : index
    %c0_13 = arith.constant 0 : index
    %7 = vector.load %arg5[%c0_11, %c0_12, %c0_13] : memref<1x1x1xf32, #tpu.memory_space<vmem>>, vector<1x1x1xf32>
    %8 = arith.addf %6, %7 : vector<1x1x1xf32>
    %c0_14 = arith.constant 0 : index
    %c0_15 = arith.constant 0 : index
    %c0_16 = arith.constant 0 : index
    %9 = vector.load %arg7[%c0_14, %c0_15, %c0_16] : memref<1x1x1xf32, #tpu.memory_space<vmem>>, vector<1x1x1xf32>
    tpu.vector_store %arg7[%c0_14, %c0_15, %c0_16], %8 {strides = array<i32>} : memref<1x1x1xf32, #tpu.memory_space<vmem>>, vector<1x1x1xf32>,
    return
  }
  func.func @transform_0(%arg0: i32, %arg1: memref<32xi32, #tpu.memory_space<smem>>) -> (i32, i32, i32) {
    %c4_i32 = arith.constant 4 : i32
    %0 = arith.muli %arg0, %c4_i32 : i32
    %c0_i32 = arith.constant 0 : i32
    %1 = arith.addi %0, %c0_i32 : i32
    %2 = arith.index_cast %1 : i32 to index
    %3 = memref.load %arg1[%2] : memref<32xi32, #tpu.memory_space<smem>>
    %c0_i32_0 = arith.constant 0 : i32
    %c0_i32_1 = arith.constant 0 : i32
    %c0_i32_2 = arith.constant 0 : i32
    return %3, %c0_i32_0, %c0_i32_1 : i32, i32, i32
  }
  func.func @transform_1(%arg0: i32, %arg1: memref<32xi32, #tpu.memory_space<smem>>) -> (i32, i32, i32) {
    %c4_i32 = arith.constant 4 : i32
    %0 = arith.muli %arg0, %c4_i32 : i32
    %c1_i32 = arith.constant 1 : i32
    %1 = arith.addi %0, %c1_i32 : i32
    %2 = arith.index_cast %1 : i32 to index
    %3 = memref.load %arg1[%2] : memref<32xi32, #tpu.memory_space<smem>>
    %c0_i32 = arith.constant 0 : i32
    %c0_i32_0 = arith.constant 0 : i32
    %c0_i32_1 = arith.constant 0 : i32
    return %3, %c0_i32, %c0_i32_0 : i32, i32, i32
  }
  func.func @transform_2(%arg0: i32, %arg1: memref<32xi32, #tpu.memory_space<smem>>) -> (i32, i32, i32) {
    %c4_i32 = arith.constant 4 : i32
    %0 = arith.muli %arg0, %c4_i32 : i32
    %c2_i32 = arith.constant 2 : i32
    %1 = arith.addi %0, %c2_i32 : i32
    %2 = arith.index_cast %1 : i32 to index
    %3 = memref.load %arg1[%2] : memref<32xi32, #tpu.memory_space<smem>>
    %c0_i32 = arith.constant 0 : i32
    %c0_i32_0 = arith.constant 0 : i32
    %c0_i32_1 = arith.constant 0 : i32
    return %3, %c0_i32, %c0_i32_0 : i32, i32, i32
  }
  func.func @transform_3(%arg0: i32, %arg1: memref<32xi32, #tpu.memory_space<smem>>) -> (i32, i32, i32) {
    %c4_i32 = arith.constant 4 : i32
    %0 = arith.muli %arg0, %c4_i32 : i32
    %c3_i32 = arith.constant 3 : i32
    %1 = arith.addi %0, %c3_i32 : i32
    %2 = arith.index_cast %1 : i32 to index
    %3 = memref.load %arg1[%2] : memref<32xi32, #tpu.memory_space<smem>>
    %c0_i32 = arith.constant 0 : i32
    %c0_i32_0 = arith.constant 0 : i32
    %c0_i32_1 = arith.constant 0 : i32
    return %3, %c0_i32, %c0_i32_0 : i32, i32, i32
  }
  func.func @transform_4(%arg0: i32, %arg1: memref<32xi32, #tpu.memory_space<smem>>) -> (i32, i32, i32) {
    %c0_i32 = arith.constant 0 : i32
    %c0_i32_0 = arith.constant 0 : i32
    %c0_i32_1 = arith.constant 0 : i32
    %c0_i32_2 = arith.constant 0 : i32
    return %c0_i32, %c0_i32_0, %c0_i32_1 : i32, i32, i32
  }
  func.func @transform_5(%arg0: i32, %arg1: memref<32xi32, #tpu.memory_space<smem>>) -> (i32, i32, i32) {
    %c0_i32 = arith.constant 0 : i32
    %c0_i32_0 = arith.constant 0 : i32
    %c0_i32_1 = arith.constant 0 : i32
    return %arg0, %c0_i32, %c0_i32_0 : i32, i32, i32
  }
}

</mosaic_0001>

<bundles_post_ra>
// kernel: tpu_custom_call.1
= control target key start
LH: loop header
LB: loop body
LE: loop exit
PB: predicated region body
PF: predicated region fallthrough
CT: control target
= control target key end

     0   :  { %s551_s0 = inlined_call_operand.vmem [shape: s32[32], index: 0, kind: input, shape index: {}]   ;;  %s552_s1 = inlined_call_operand.vmem [shape: f32[18,1,1], index: 1, kind: input, shape index: {}]   ;;  %s553_s2 = inlined_call_operand.vmem [shape: f32[18,1,1], index: 2, kind: input, shape index: {}]   ;;  %s554_s3 = inlined_call_operand.vmem [shape: f32[18,1,1], index: 3, kind: input, shape index: {}]   ;;  %s555_s4 = inlined_call_operand.vmem [shape: f32[18,1,1], index: 4, kind: input, shape index: {}]   ;;  %s556_s6 = inlined_call_operand.vmem [shape: f32[8,1,1], index: 6, kind: output, shape index: {}]   ;;  %s557_s5 = inlined_call_operand.<no memory space> [shape: f32[1,1,1], index: 5, kind: input, shape index: {}]  }
   0x1   :  { %s11_s23 = sshll.u32 %s551_s0, 4  ;;  %v15_v0 = vstv %s557_s5  ;;  %s12_s23 = int_to_ptr.vmem [resolvable:$true] %s11_s23 }
   0x2   :  { %16 = vst [vmem:[#allocation4] sm:$0x1] %v15_v0  ;;  %s461_s26 = scalar_lea.vmem %s12_s23, 16  ;;  %p466_p1 = scmp.lt.s32.totalorder %s12_s23, %s12_s23 }
   0x3   :  { %p462_p0 = scmp.ne.s32.totalorder %s12_s23, %s461_s26  ;;  %p467_p2 = scmp.lt.s32.totalorder %s461_s26, %s461_s26 }
   0x5   :  { %p468_p3 = por %p467_p2, %p466_p1 }
   0x7   :  { %p469_p4 = pnand %p468_p3, %p462_p0 }
   0x9   :  { %472 = shalt.err (!%p469_p4)  }
   0xa   :  { %s483_s27 = smov [#allocation3]  }
   0xb   :  { %14 = dma.vmem_to_smem %s12_s23, 16, %s483_s27, [#allocation2] }
   0xc   :  { %477 = dma.done.wait [#allocation2], 16 }
   0xd   :  { %478 = vsyncadd [#allocation2], 4294967280 }
   0xe   :  { %18 = sfence }
   0xf   :  { %s525_s28 = smov 0  }
  0x10 LB: > { %s425_s0 = sadd.s32 4294967295, %s481_s28   ;;  %p437_p5 = scmp.ge.s32.totalorder %s481_s28, 1  ;;  %s481_s28 = sphi %s525_s28, %s24_s28  }
  0x11   : > { %p262_p6 = scmp.lt.s32.totalorder %s481_s28, 9 }
  0x13   : > { %p263_p7 = pnand %p437_p5, %p262_p6 }
  0x14   : > { %s438_s5 = sshll.u32 (!%p263_p7), %s425_s0, 2  ;;  %p340_p8 = scmp.lt.s32.totalorder (!%p263_p7), %s425_s0, 7 }
  0x15   : > { %266 = sbr.rel (%p263_p7) target bundleno = 41 (0x29), region = 40  ;;  %s307_s29 = sld [smem:[#allocation3 + %s438_s5]] (!%p263_p7) }
  0x16   : > { %s314_s30 = sadd.s32 (!%p263_p7), 1, %s438_s5  ;;  %s323_s8 = sadd.s32 (!%p263_p7), 2, %s438_s5 }
  0x17   : > { %s315_s7 = sld [smem:[#allocation3 + %s314_s30]] (!%p263_p7)  ;;  %s332_s10 = sadd.s32 (!%p263_p7), 3, %s438_s5 }
  0x18   : > { %s324_s9 = sld [smem:[#allocation3 + %s323_s8]] (!%p263_p7) }
  0x19   : > { %s333_s11 = sld [smem:[#allocation3 + %s332_s10]] (!%p263_p7) }
  0x1a   : > { %s559_s0 = smov (!%p340_p8, %s425_s0), 7  ;;  %v343_v1 = vld [vmem:[#allocation4] sm:$0x1]  ;;  %vm352_vm0 = vcmask 0  }
  0x1b   : > { %p308_p9 = scmp.lt.s32.totalorder %s307_s29, 17  ;;  %s342_s26 = scalar_lea.vmem %s556_s6, %s559_s0 }
  0x1d   : > { %p316_p10 = scmp.lt.s32.totalorder %s315_s7, 17  ;;  %s561_s29 = smov (!%p308_p9, %s307_s29), 17 }
  0x1e   : > { %s310_s14 = scalar_lea.vmem %s552_s1, %s561_s29  ;;  %p325_p11 = scmp.lt.s32.totalorder %s324_s9, 17 }
  0x1f   : > { %s563_s7 = smov (!%p316_p10, %s315_s7), 17  ;;  %p334_p12 = scmp.lt.s32.totalorder %s333_s11, 17  ;;  %v344_v2 = vld [vmem:[%s310_s14] sm:$0x1] }
  0x20   : > { %s318_s17 = scalar_lea.vmem %s553_s2, %s563_s7  ;;  %s565_s9 = smov (!%p325_p11, %s324_s9), 17  ;;  %v345_v3 = vadd.f32 %v344_v2, %v343_v1 }
  0x21   : > { %v346_v4 = vld [vmem:[%s318_s17] sm:$0x1]  ;;  %s567_s11 = smov (!%p334_p12, %s333_s11), 17  ;;  %s327_s20 = scalar_lea.vmem %s554_s3, %s565_s9 }
  0x22   : > { %v347_v5 = vadd.f32 %v346_v4, %v345_v3  ;;  %s336_s23 = scalar_lea.vmem %s555_s4, %s567_s11  ;;  %v348_v6 = vld [vmem:[%s327_s20] sm:$0x1] }
  0x23   : > { %v350_v8 = vld [vmem:[%s336_s23] sm:$0x1] }
  0x24   : > { %v349_v7 = vadd.f32 %v348_v6, %v347_v5 }
  0x26   : > { %v351_v9 = vadd.f32 %v350_v8, %v349_v7 }
  0x28   : > { %353 = vst.msk [vmem:[%s342_s26] sm:$0x1] %vm352_vm0, %v351_v9 }
  0x29 PF: > { %s24_s28 = sadd.s32 1, %s481_s28  }
  0x2a   : > { %p21_p13 = scmp.ge.s32.totalorder %s24_s28, 10  }
  0x2c   :  { %23 = sbr.rel (!%p21_p13) target bundleno = 16 (0x10), region = 79 }

</bundles_post_ra>
